<compile_context>
chip_gen: v6e
topology: v6e:2x2x1
jax: 0.10.0
libtpu: 0.0.40
codegen_flags: <defaults>
</compile_context>

<pallas_src>
import jax
import jax.numpy as jnp
from jax.experimental import pallas as pl
from jax.experimental.pallas import tpu as pltpu


_MIN_TM = 128    # one MXU tile of batch rows; lower bound for a batch tile
_MAX_TM = 1024   # HBM-roofline sweet spot (>=512-wide tiles ~85%+ of roofline)


# ----------------------------------------------------------------------------
# Pallas kernel: out = relu(x @ W1 + b1) @ W2 + b2
#   x enters as f32 and is cast to bf16 in-kernel; W1/W2 are bf16 MXU inputs;
#   accumulation, bias add and ReLU stay f32; output stored as bf16.
# ----------------------------------------------------------------------------
def _encoder_kernel(x_ref, w1_ref, b1_ref, w2_ref, b2_ref, o_ref):
    # In-kernel cast: avoids a separate XLA cast op that would read f32 x,
    # write bf16, then have the kernel re-read bf16 (extra HBM pass).
    x = x_ref[...].astype(jnp.bfloat16)
    # Layer 1: bf16 MXU matmul with f32 accumulation, f32 bias + ReLU (VPU).
    h = jnp.dot(x, w1_ref[...], preferred_element_type=jnp.float32)
    h = jnp.maximum(h + b1_ref[...], 0.0)
    # Layer 2: re-quantize activation to bf16 for the MXU, accumulate in f32.
    out = jnp.dot(h.astype(jnp.bfloat16), w2_ref[...],
                  preferred_element_type=jnp.float32)
    # bf16 store halves output writeback bytes on this memory-bound kernel.
    o_ref[...] = (out + b2_ref[...]).astype(o_ref.dtype)


def _pick_batch_tile(batch, tm):
    """Pick the batch tile: big (HBM roofline) but with >=2 grid steps when
    possible so the 'parallel' axis feeds both TensorCores on v7x."""
    if tm is not None:
        tm = min(tm, batch)
        # Keep the sublane constraint: tile must be a multiple of 8 unless it
        # equals the full batch dimension.
        return tm if tm == batch else max(8, (tm // 8) * 8)
    tm = min(_MAX_TM, batch)
    if batch > _MIN_TM and pl.cdiv(batch, tm) < 2:
        half = -(-batch // 2)                       # ceil(batch / 2)
        tm = max(_MIN_TM, ((half + 7) // 8) * 8)    # round up to sublane mult
    return tm


def _encoder_forward(x, w1, b1, w2, b2, *, tm=None, out_dtype=jnp.bfloat16):
    """x: (B, D_in) f32; w1: (D_in, D_hid) bf16; b1: (1, D_hid) f32;
    w2: (D_hid, D_emb) bf16; b2: (1, D_emb) f32  ->  (B, D_emb) out_dtype."""
    B, d_in = x.shape
    d_emb = w2.shape[1]
    tm = _pick_batch_tile(B, tm)
    # cdiv grid: when B is not a multiple of tm the last block is padded.
    # Padded tail rows are *computed* on garbage data but masked on store,
    # so they never reach HBM (harmless by construction; each output row only
    # depends on its own input row).
    grid = (pl.cdiv(B, tm),)

    return pl.pallas_call(
        _encoder_kernel,
        out_shape=jax.ShapeDtypeStruct((B, d_emb), out_dtype),
        grid_spec=pltpu.PrefetchScalarGridSpec(
            num_scalar_prefetch=0,
            grid=grid,
            in_specs=[
                # x: tiled along batch -> next tile's DMA pipelined under compute.
                pl.BlockSpec((tm, d_in), lambda i: (i, 0)),
                # Weights / biases: constant index maps -> VMEM-resident blocks.
                # TODO(synk): when real SpeakerNet dims replace these small
                # placeholders, add a trailing "arbitrary" K-reduction grid axis
                # with an f32 VMEM accumulator (P3), set vmem_limit_bytes, and
                # give the resident blocks pipeline_mode=pl.Buffered(1) -- both
                # matter on v7x's 64 MiB VMEM.
                pl.BlockSpec(w1.shape, lambda i: (0, 0)),
                pl.BlockSpec(b1.shape, lambda i: (0, 0)),
                pl.BlockSpec(w2.shape, lambda i: (0, 0)),
                pl.BlockSpec(b2.shape, lambda i: (0, 0)),
            ],
            out_specs=pl.BlockSpec((tm, d_emb), lambda i: (i, 0)),
        ),
        compiler_params=pltpu.CompilerParams(
            # Independent batch tiles: shard across both TensorCores on v7x.
            dimension_semantics=("parallel",),
        ),
    )(x, w1, b1, w2, b2)


# ----------------------------------------------------------------------------
# Inner (synthetic) speaker-encoder module
# ----------------------------------------------------------------------------
class SpeakerEncoder:
    def __init__(self, d_in, d_hid, d_emb, key):
        k1, k2 = jax.random.split(key, 2)
        # Glorot-ish init; weights stored in bf16 (MXU input dtype), biases f32.
        # TODO(synk): if SpeakerNet weights are ever int8-quantized, target
        # fp8/bf16 on v7x instead -- its MXU has no integer path.
        self.w1 = (jax.random.normal(k1, (d_in, d_hid), jnp.float32)
                   / jnp.sqrt(jnp.float32(d_in))).astype(jnp.bfloat16)
        self.b1 = jnp.zeros((1, d_hid), jnp.float32)
        self.w2 = (jax.random.normal(k2, (d_hid, d_emb), jnp.float32)
                   / jnp.sqrt(jnp.float32(d_hid))).astype(jnp.bfloat16)
        self.b2 = jnp.zeros((1, d_emb), jnp.float32)

    def __call__(self, x, label=None, domain_label=None):
        # label / domain_label are training-time-only arguments in SpeakerNet;
        # the forward embedding path ignores them.  x stays f32; the bf16 cast
        # happens inside the kernel.
        return _encoder_forward(x, self.w1, self.b1, self.w2, self.b2)


# ----------------------------------------------------------------------------
# WrappedModel: exact delegation semantics of the PyTorch module
# ----------------------------------------------------------------------------
class WrappedModel:
    def __init__(self, model):
        self.module = model

    def __call__(self, x, label=None, domain_label=None):
        return self.module(x, label, domain_label)


if __name__ == "__main__":
    key = jax.random.PRNGKey(0)
    k_x, k_params = jax.random.split(key)

    # Small but representative shapes:
    #  - B=300 exercises both the >=2-step pipelined/parallel grid and the
    #    masked partial edge block (tiles of 152 -> blocks of 152 + 148 rows).
    #  - 256-wide hidden/embedding dims are MXU-width-aligned for v6e/v7x.
    B, D_IN, D_HID, D_EMB = 300, 128, 256, 256
    x = jax.random.normal(k_x, (B, D_IN), jnp.float32)

    inner = SpeakerEncoder(D_IN, D_HID, D_EMB, k_params)
    model = WrappedModel(inner)

    out = model(x, label=None, domain_label=None)
    out = jax.block_until_ready(out)

    # Pure-JAX reference following the same bf16-MXU-input / f32-accumulate path.
    x_bf = x.astype(jnp.bfloat16)
    h_ref = jnp.maximum(
        jnp.dot(x_bf, inner.w1, preferred_element_type=jnp.float32) + inner.b1,
        0.0)
    ref = jnp.dot(h_ref.astype(jnp.bfloat16), inner.w2,
                  preferred_element_type=jnp.float32) + inner.b2

    assert out.shape == (B, D_EMB)
    assert out.dtype == jnp.bfloat16
    assert jnp.allclose(out.astype(jnp.float32), ref, atol=5e-2, rtol=5e-2)

    print("KERNEL_OK")
</pallas_src>

<mosaic_0001>
module attributes {stable_mosaic.version = 11 : i64} {
  func.func @_encoder_kernel(%arg0: i32, %arg1: memref<152x128xf32, #tpu.memory_space<vmem>>, %arg2: memref<128x256xbf16, #tpu.memory_space<vmem>>, %arg3: memref<1x256xf32, #tpu.memory_space<vmem>>, %arg4: memref<256x256xbf16, #tpu.memory_space<vmem>>, %arg5: memref<1x256xf32, #tpu.memory_space<vmem>>, %arg6: memref<152x256xbf16, #tpu.memory_space<vmem>>) attributes {dimension_semantics = [#tpu.dimension_semantics<parallel>], iteration_bounds = array<i64: 2>, scalar_prefetch = 0 : i64, scratch_operands = 0 : i64, tpu.core_type = #tpu.core_type<tc>, window_params = [{transform_indices = @transform_0, window_bounds = array<i64: 152, 128>}, {pipeline_mode = #tpu.pipeline_mode<synchronous>, transform_indices = @transform_1, window_bounds = array<i64: 128, 256>}, {pipeline_mode = #tpu.pipeline_mode<synchronous>, transform_indices = @transform_2, window_bounds = array<i64: 1, 256>}, {pipeline_mode = #tpu.pipeline_mode<synchronous>, transform_indices = @transform_3, window_bounds = array<i64: 256, 256>}, {pipeline_mode = #tpu.pipeline_mode<synchronous>, transform_indices = @transform_4, window_bounds = array<i64: 1, 256>}, {transform_indices = @transform_5, window_bounds = array<i64: 152, 256>}]} {
    %c0 = arith.constant 0 : index
    %c0_0 = arith.constant 0 : index
    %0 = vector.load %arg1[%c0, %c0_0] : memref<152x128xf32, #tpu.memory_space<vmem>>, vector<152x128xf32>
    %1 = arith.truncf %0 : vector<152x128xf32> to vector<152x128xbf16>
    %c0_1 = arith.constant 0 : index
    %c0_2 = arith.constant 0 : index
    %2 = vector.load %arg2[%c0_1, %c0_2] : memref<128x256xbf16, #tpu.memory_space<vmem>>, vector<128x256xbf16>
    %cst = arith.constant dense<0.000000e+00> : vector<152x256xf32>
    %3 = tpu.matmul %1, %2, %cst {dimension_numbers = #tpu.dot_dimension_numbers<[1], [0], [0], [1], [0, 0, 1, 1], [], []>} : vector<152x128xbf16>, vector<128x256xbf16>, vector<152x256xf32> -> vector<152x256xf32>
    %c0_3 = arith.constant 0 : index
    %c0_4 = arith.constant 0 : index
    %4 = vector.load %arg3[%c0_3, %c0_4] : memref<1x256xf32, #tpu.memory_space<vmem>>, vector<1x256xf32>
    %5 = vector.broadcast %4 : vector<1x256xf32> to vector<152x256xf32>
    %6 = arith.addf %3, %5 : vector<152x256xf32>
    %cst_5 = arith.constant 0.000000e+00 : f32
    %7 = vector.broadcast %cst_5 : f32 to vector<152x256xf32>
    %8 = arith.maximumf %6, %7 : vector<152x256xf32>
    %9 = arith.truncf %8 : vector<152x256xf32> to vector<152x256xbf16>
    %c0_6 = arith.constant 0 : index
    %c0_7 = arith.constant 0 : index
    %10 = vector.load %arg4[%c0_6, %c0_7] : memref<256x256xbf16, #tpu.memory_space<vmem>>, vector<256x256xbf16>
    %cst_8 = arith.constant dense<0.000000e+00> : vector<152x256xf32>
    %11 = tpu.matmul %9, %10, %cst_8 {dimension_numbers = #tpu.dot_dimension_numbers<[1], [0], [0], [1], [0, 0, 1, 1], [], []>} : vector<152x256xbf16>, vector<256x256xbf16>, vector<152x256xf32> -> vector<152x256xf32>
    %c0_9 = arith.constant 0 : index
    %c0_10 = arith.constant 0 : index
    %12 = vector.load %arg5[%c0_9, %c0_10] : memref<1x256xf32, #tpu.memory_space<vmem>>, vector<1x256xf32>
    %13 = vector.broadcast %12 : vector<1x256xf32> to vector<152x256xf32>
    %14 = arith.addf %11, %13 : vector<152x256xf32>
    %15 = arith.truncf %14 : vector<152x256xf32> to vector<152x256xbf16>
    %c0_11 = arith.constant 0 : index
    %c0_12 = arith.constant 0 : index
    %16 = vector.load %arg6[%c0_11, %c0_12] : memref<152x256xbf16, #tpu.memory_space<vmem>>, vector<152x256xbf16>
    tpu.vector_store %arg6[%c0_11, %c0_12], %15 {strides = array<i32>} : memref<152x256xbf16, #tpu.memory_space<vmem>>, vector<152x256xbf16>,
    return
  }
  func.func @transform_0(%arg0: i32) -> (i32, i32) {
    %c0_i32 = arith.constant 0 : i32
    %c0_i32_0 = arith.constant 0 : i32
    return %arg0, %c0_i32 : i32, i32
  }
  func.func @transform_1(%arg0: i32) -> (i32, i32) {
    %c0_i32 = arith.constant 0 : i32
    %c0_i32_0 = arith.constant 0 : i32
    %c0_i32_1 = arith.constant 0 : i32
    return %c0_i32, %c0_i32_0 : i32, i32
  }
  func.func @transform_2(%arg0: i32) -> (i32, i32) {
    %c0_i32 = arith.constant 0 : i32
    %c0_i32_0 = arith.constant 0 : i32
    %c0_i32_1 = arith.constant 0 : i32
    return %c0_i32, %c0_i32_0 : i32, i32
  }
  func.func @transform_3(%arg0: i32) -> (i32, i32) {
    %c0_i32 = arith.constant 0 : i32
    %c0_i32_0 = arith.constant 0 : i32
    %c0_i32_1 = arith.constant 0 : i32
    return %c0_i32, %c0_i32_0 : i32, i32
  }
  func.func @transform_4(%arg0: i32) -> (i32, i32) {
    %c0_i32 = arith.constant 0 : i32
    %c0_i32_0 = arith.constant 0 : i32
    %c0_i32_1 = arith.constant 0 : i32
    return %c0_i32, %c0_i32_0 : i32, i32
  }
  func.func @transform_5(%arg0: i32) -> (i32, i32) {
    %c0_i32 = arith.constant 0 : i32
    %c0_i32_0 = arith.constant 0 : i32
    return %arg0, %c0_i32 : i32, i32
  }
}

</mosaic_0001>

<bundles_post_ra>
// kernel: tpu_custom_call.1
= control target key start
LH: loop header
LB: loop body
LE: loop exit
PB: predicated region body
PF: predicated region fallthrough
CT: control target
= control target key end

     0   :  { %10 = vsyncpa [#allocation3], 0  ;;  %s2004_s0 = inlined_call_operand.hbm [shape: f32[300,128], index: 0, kind: input, shape index: {}]   ;;  %s2005_s1 = inlined_call_operand.hbm [shape: bf16[128,256], index: 1, kind: input, shape index: {}]   ;;  %s2006_s2 = inlined_call_operand.vmem [shape: f32[1,256], index: 2, kind: input, shape index: {}]   ;;  %s2007_s3 = inlined_call_operand.hbm [shape: bf16[256,256], index: 3, kind: input, shape index: {}]   ;;  %s2008_s4 = inlined_call_operand.vmem [shape: f32[1,256], index: 4, kind: input, shape index: {}]   ;;  %s2009_s5 = inlined_call_operand.hbm [shape: bf16[300,256], index: 5, kind: output, shape index: {}]  }
   0x1   :  { %12 = vsyncpa [#allocation3 + $0x1], 0 }
   0x2   :  { %13 = vsyncpa [#allocation6], 0 }
   0x3   :  { %14 = vsyncpa [#allocation4], 0 }
   0x4   :  { %16 = vsyncpa [#allocation4 + $0x1], 0  ;;  %s1648_s18 = smov 0   ;;  %s1650_s19 = smov 0  }
   0x5   :  { %s1652_s20 = smov 0   ;;  %s1654_s21 = smov 0  }
   0x6 LB: > { %s1669_s22 = sadd.s32 4294967295, %s1607_s21   ;;  %s1178_s23 = sadd.s32 4294967294, %s1607_s21   ;;  %s1607_s21 = sphi %s1654_s21, %s2032_s21   ;;  %s1603_s20 = sphi %s1652_s20, %s2031_s20   ;;  %s1599_s19 = sphi %s1650_s19, %s2030_s19   ;;  %s1595_s18 = sphi %s1648_s18, %s2029_s18  }
   0x7   : > { %p42_p0 = scmp.ne.s32.totalorder %s1599_s19, %s1595_s18  ;;  %p2011_p1 = scmp.eq.s32.totalorder %s1669_s22, 0 }
   0x8   : > { %p150_p2 = scmp.eq.s32.totalorder %s1669_s22, 1  ;;  %p156_p3 = scmp.eq.s32.totalorder %s1178_s23, 1 }
   0x9   : > { %p1678_p4 = por %p2011_p1, %p42_p0  ;;  %p1179_p5 = scmp.ge.s32.totalorder %s1607_s21, 1 }
   0xa   : > { %p1683_p6 = por %p156_p3, %p42_p0  ;;  %p163_p7 = scmp.lt.s32.totalorder %s1607_s21, 3 }
   0xb   : > { %s2015_s24 = scalar_select %p1678_p4, 1, 0 }
   0xc   : > { %s2016_s25 = scalar_select %p1683_p6, 1, 0 }
   0xd   : > { %p1688_p8 = pnand %p1179_p5, %p163_p7  ;;  %s1609_s27 = smov [#allocation5]  }
   0xe   : > { %s175_s28 = sshll.u32 %s1609_s27, 4  ;;  %s1610_s30 = smov [#allocation7]   ;;  %s176_s28 = int_to_ptr.vmem [resolvable:$true] %s175_s28 }
   0xf   : > { %s2017_s26 = scalar_select %p1688_p8, 1, 0 }
  0x10   : > { %p1327_p9 = pneg %p1688_p8  ;;  %s191_s6 = sshll.u32 %s1610_s30, 4  ;;  %s192_s6 = int_to_ptr.vmem [resolvable:$true] %s191_s6 }
  0x11   : > { %s1470_s7 = scalar_lea.vmem %s176_s28, 2048  ;;  %p1478_p5 = scmp.lt.s32.totalorder %s176_s28, %s176_s28 }
  0x12   : > { %p1697_p11 = pnand %p1327_p9, %p2011_p1  ;;  %p1471_p13 = scmp.ne.s32.totalorder %s176_s28, %s1470_s7 }
  0x13   : > { %p1479_p7 = scmp.lt.s32.totalorder %s1470_s7, %s1470_s7 }
  0x14   : > { %p1461_p12 = pneg %p1697_p11 }
  0x15   : > { %p1480_p10 = por %p1479_p7, %p1478_p5 }
  0x16   : > { %p1473_p0 = pnand %p1471_p13, %p1461_p12 }
  0x18   : > { %p1474_p3 = pneg %p1473_p0 }
  0x1a   : > { %p1481_p9 = pnand %p1480_p10, %p1474_p3 }
  0x1c   : > { %1484 = shalt.err (!%p1481_p9)
}
  0x1d   : > { %s2010_s8 = smov 128   ;;  %s1612_s9 = smov 8  }
  0x1e   : > { %1330 = dma.hbm_to_vmem [thread:$0]  (!%p1697_p11), %s2005_s1, 2048, %s176_s28, [#allocation6], %s2010_s8, %s2010_s8, %s1612_s9  }
  0x1f   : > { %s1496_s12 = scalar_lea.vmem %s192_s6, 4096  ;;  %p1504_p10 = scmp.lt.s32.totalorder %s192_s6, %s192_s6 }
  0x20   : > { %p1497_p13 = scmp.ne.s32.totalorder %s192_s6, %s1496_s12  ;;  %p1505_p3 = scmp.lt.s32.totalorder %s1496_s12, %s1496_s12 }
  0x22   : > { %p1499_p0 = pnand %p1497_p13, %p1461_p12  ;;  %p1506_p7 = por %p1505_p3, %p1504_p10 }
  0x24   : > { %p1500_p5 = pneg %p1499_p0 }
  0x26   : > { %p1507_p9 = pnand %p1506_p7, %p1500_p5 }
  0x28   : > { %1510 = shalt.err (!%p1507_p9)
}
  0x29   : > { %1333 = dma.hbm_to_vmem [thread:$0]  (!%p1697_p11), %s2007_s3, 4096, %s192_s6, [#allocation6], %s2010_s8, %s2010_s8, %s1612_s9  }
  0x2a   : > { %s1726_s15 = sadd.s32 1, %s1607_s21   ;;  %s29_s16 = sadd.s32 1, %s1603_s20 }
  0x2b   : > { %s26_s17 = ssub.s32 %s1607_s21, %s1726_s15  ;;  %p36_p12 = scmp.ne.s32.totalorder %s1603_s20, %s1599_s19 }
  0x2c   : > { %p27_p13 = scmp.eq.s32.totalorder %s26_s17, 0  ;;  %p37_p0 = scmp.eq.s32.totalorder %s1607_s21, 0 }
  0x2d   : > { %p1736_p5 = por %p150_p2, %p36_p12  ;;  %p1344_p10 = scmp.lt.s32.totalorder %s1607_s21, 2 }
  0x2e   : > { %s1742_s27 = scalar_select %p27_p13, %s1603_s20, %s29_s16  }
  0x2f   : > { %s2019_s23 = scalar_select %p1736_p5, 1, 0 }
  0x30   : > { %p38_p3 = por %p37_p0, %p36_p12  ;;  %s208_s28 = sand.u32 1, %s1603_s20  }
  0x31   : > { %s1313_s29 = smul.u32 152, %s208_s28  ;;  %s1757_s14 = scalar_lea.sflag [#allocation3], %s208_s28 }
  0x32   : > { %s1258_s30 = smul.u32 2432, %s1607_s21  ;;  %p1746_p11 = pnand %p1344_p10, %p38_p3 }
  0x33   : > { %s212_s12 = scalar_lea.vmem [#allocation2], %s1313_s29 }
  0x34   : > { %s1753_s11 = scalar_lea.hbm %s2004_s0, %s1258_s30  ;;  %s219_s13 = sshll.u32 %s212_s12, 4  ;;  %s1755_s13 = int_to_ptr.vmem [resolvable:$true] %s219_s13 }
  0x35   : > { %s1511_s16 = scalar_lea.hbm %s1753_s11, 2432  ;;  %p1513_p7 = pneg %p1746_p11 }
  0x36   : > { %p1512_p2 = scmp.ne.s32.totalorder %s1753_s11, %s1511_s16  ;;  %s1516_s30 = scalar_lea.hbm %s2004_s0, 4864 }
  0x37   : > { %p1517_p13 = scmp.lt.s32.totalorder %s1753_s11, %s2004_s0  ;;  %p1518_p0 = scmp.lt.s32.totalorder %s1516_s30, %s1511_s16 }
  0x38   : > { %p1514_p9 = pnand %p1513_p7, %p1512_p2 }
  0x39   : > { %p1519_p10 = por %p1518_p0, %p1517_p13 }
  0x3a   : > { %p1515_p12 = pneg %p1514_p9 }
  0x3c   : > { %p1520_p3 = pnand %p1519_p10, %p1515_p12 }
  0x3e   : > { %1523 = shalt.err (!%p1520_p3)
}
  0x3f   : > { %s1524_s28 = scalar_lea.vmem %s1755_s13, 2432  ;;  %s1613_s29 = smov [#allocation2]  }
  0x40   : > { %p1525_p1 = scmp.ne.s32.totalorder %s1755_s13, %s1524_s28  ;;  %s1529_s12 = sshll.u32 %s1613_s29, 4  ;;  %s1530_s12 = int_to_ptr.vmem [resolvable:$false] %s1529_s12 }
  0x41   : > { %s1531_s17 = scalar_lea.vmem %s1530_s12, 4864  ;;  %p1532_p9 = scmp.lt.s32.totalorder %s1755_s13, %s1530_s12 }
  0x42   : > { %p1527_p6 = pnand %p1525_p1, %p1513_p7  ;;  %p1533_p5 = scmp.lt.s32.totalorder %s1531_s17, %s1524_s28 }
  0x44   : > { %p1528_p2 = pneg %p1527_p6  ;;  %p1534_p4 = por %p1533_p5, %p1532_p9 }
  0x46   : > { %p1535_p8 = pnand %p1534_p4, %p1528_p2 }
  0x48   : > { %1538 = shalt.err (!%p1535_p8)
}
  0x49   : > { %s2021_s8 = smov 128   ;;  %p2022_p1 = scmp.ne.s32.totalorder %s2017_s26, 0 }
  0x4a   : > { %1337 = dma.hbm_to_vmem [thread:$0]  (!%p1746_p11), %s1753_s11, 2432, %s1755_s13, %s1757_s14, %s2021_s8, %s2021_s8, %s1612_s9  }
  0x4b   : > { %231 = sbr.rel (%p2022_p1) target bundleno = 608 (0x260), region = 40  ;;  %s1784_s16 = sand.u32 (!%p2022_p1), 1, %s1599_s19  }
  0x4c   : > { %s1314_s7 = smul.u32 (!%p2022_p1), 152, %s1784_s16  ;;  %s234_s30 = scalar_lea.sflag (!%p2022_p1), [#allocation3], %s1784_s16 }
  0x4d   : > { %p2023_p4 = scmp.ne.s32.totalorder (!%p2022_p1), %s2015_s24, 0 }
  0x4e   : > { %s1790_s6 = scalar_lea.vmem (!%p2022_p1), [#allocation2], %s1314_s7 }
  0x50   : > { %1582 = dma.done.wait (%p2023_p4), %s234_s30, 2432  }
  0x51   : > { %1584 = vsyncadd (%p2023_p4), %s234_s30, 4294964864  ;;  %p2024_p6 = scmp.eq.s32.totalorder %s1669_s22, 0 }
  0x53   : > { %1586 = dma.done.wait (%p2024_p6), [#allocation6], 6144   ;;  %p2025_p8 = pmov %p2024_p6 }
  0x54   : > { %v1614_v0 = vmov 0   ;;  %v1387_v1 = vld [vmem:[#allocation5 + $0x74] ss:$8 sps:$4 sm:$0xff]   ;;  %v1389_v2 = vld [vmem:[#allocation5 + $0x70] ss:$8 sps:$4 sm:$0xff]   ;;  %v278_v30 = vld [vmem:[%s1790_s6 + $0x18] sm:$0xff] }
  0x55   : > { %1588 = vsyncadd (%p2025_p8), [#allocation6], 4294961152  ;;  %444 = vmatprep.mubr.bf16.mxu0 %v1614_v0  ;;  %412 = vmatprep.subr.bf16.mxu0 %v1387_v1  ;;  %v1390_v3 = vld [vmem:[#allocation5 + $0x64] ss:$8 sps:$4 sm:$0xff]   ;;  %v1392_v4 = vld [vmem:[#allocation5 + $0x60] ss:$8 sps:$4 sm:$0xff]  }
  0x56   : > { %413 = vmatpush1.bf16.msra.mxu0 %v1389_v2  ;;  %v1393_v5 = vld [vmem:[#allocation5 + $0x54] ss:$8 sps:$4 sm:$0xff]   ;;  %v1395_v6 = vld [vmem:[#allocation5 + $0x50] ss:$8 sps:$4 sm:$0xff]   ;;  %v1396_v7 = vld [vmem:[#allocation5 + $0x44] ss:$8 sps:$4 sm:$0xff]  }
  0x57   : > { %414 = vmatprep.subr.bf16.mxu0 %v1390_v3  ;;  %v1398_v8 = vld [vmem:[#allocation5 + $0x40] ss:$8 sps:$4 sm:$0xff]   ;;  %v1399_v9 = vld [vmem:[#allocation5 + $0x34] ss:$8 sps:$4 sm:$0xff]   ;;  %v1401_v10 = vld [vmem:[#allocation5 + $0x30] ss:$8 sps:$4 sm:$0xff]  }
  0x58   : > { %v1402_v11 = vld [vmem:[#allocation5 + $0x24] ss:$8 sps:$4 sm:$0xff]   ;;  %v1413_v12 = vld [vmem:[#allocation7 + $0x74] ss:$8 sps:$4 sm:$0xff]   ;;  %v1404_v13 = vld [vmem:[#allocation5 + $0x20] ss:$8 sps:$4 sm:$0xff]  }
  0x59   : > { %v1411_v14 = vld [vmem:[#allocation7 + $0x70] ss:$8 sps:$4 sm:$0xff]   ;;  %v1405_v15 = vld [vmem:[#allocation5 + $0x14] ss:$8 sps:$4 sm:$0xff]   ;;  %v1416_v16 = vld [vmem:[#allocation7 + $0x64] ss:$8 sps:$4 sm:$0xff]   ;;  %1281 = vmatprep.subr.bf16.mxu1 %v1413_v12 }
  0x5a   : > { %415 = vmatpush1.bf16.msra.mxu0 %v1392_v4  ;;  %1297 = vmatpush1.bf16.msra.mxu1 %v1411_v14  ;;  %v1407_v17 = vld [vmem:[#allocation5 + $0x10] ss:$8 sps:$4 sm:$0xff]   ;;  %v1414_v18 = vld [vmem:[#allocation7 + $0x60] ss:$8 sps:$4 sm:$0xff]   ;;  %v1408_v19 = vld [vmem:[#allocation5 + $0x4] ss:$8 sps:$4 sm:$0xff]  }
  0x5b   : > { %416 = vmatprep.subr.bf16.mxu0 %v1393_v5  ;;  %1282 = vmatprep.subr.bf16.mxu1 %v1416_v16  ;;  %v1419_v20 = vld [vmem:[#allocation7 + $0x54] ss:$8 sps:$4 sm:$0xff]   ;;  %v1410_v21 = vld [vmem:[#allocation5] ss:$8 sps:$4 sm:$0xff]   ;;  %v1417_v24 = vld [vmem:[#allocation7 + $0x50] ss:$8 sps:$4 sm:$0xff]  }
  0x5c   : > { %v275_v22 = vld [vmem:[%s1790_s6] sm:$0xff]  ;;  %v276_v23 = vld [vmem:[%s1790_s6 + $0x8] sm:$0xff]  ;;  %v277_v29 = vld [vmem:[%s1790_s6 + $0x10] sm:$0xff]  ;;  %s1897_s13 = scalar_lea.vmem [#allocation8], %s1314_s7  ;;  %s1280_s14 = smul.u32 2432, %s1669_s22 }
  0x5d   : > { %v1422_v25 = vld [vmem:[#allocation7 + $0x44] ss:$8 sps:$4 sm:$0xff]   ;;  %v294_v26 = vpack.c.bf16 %v276_v23, %v275_v22  ;;  %v1420_v27 = vld [vmem:[#allocation7 + $0x40] ss:$8 sps:$4 sm:$0xff]   ;;  %v1425_v28 = vld [vmem:[#allocation7 + $0x34] ss:$8 sps:$4 sm:$0xff]   ;;  %v295_v33 = vpack.c.bf16 %v278_v30, %v277_v29 }
  0x5e   : > { %417 = vmatpush1.bf16.msra.mxu0 %v1395_v6  ;;  %1298 = vmatpush1.bf16.msra.mxu1 %v1414_v18  ;;  %v1423_v31 = vld [vmem:[#allocation7 + $0x30] ss:$8 sps:$4 sm:$0xff]   ;;  %v1428_v32 = vld [vmem:[#allocation7 + $0x24] ss:$8 sps:$4 sm:$0xff]   ;;  %v1426_v34 = vld [vmem:[#allocation7 + $0x20] ss:$8 sps:$4 sm:$0xff]   ;;  %s1958_s12 = scalar_lea.hbm %s2009_s5, %s1280_s14 }
  0x5f   : > { %418 = vmatprep.subr.bf16.mxu0 %v1396_v7  ;;  %1283 = vmatprep.subr.bf16.mxu1 %v1419_v20  ;;  %v1431_v35 = vld [vmem:[#allocation7 + $0x14] ss:$8 sps:$4 sm:$0xff]   ;;  %v1429_v38 = vld [vmem:[#allocation7 + $0x10] ss:$8 sps:$4 sm:$0xff]   ;;  %v1434_v39 = vld [vmem:[#allocation7 + $0x4] ss:$8 sps:$4 sm:$0xff]  }
  0x60   : > { %v279_v36 = vld [vmem:[%s1790_s6 + $0x20] sm:$0xff]  ;;  %v280_v37 = vld [vmem:[%s1790_s6 + $0x28] sm:$0xff]  ;;  %v281_v43 = vld [vmem:[%s1790_s6 + $0x30] sm:$0xff]  ;;  %s1086_s10 = sshll.u32 %s1897_s13, 4  ;;  %s1072_s22 = scalar_lea.sflag [#allocation4], %s1784_s16  ;;  %s1960_s10 = int_to_ptr.vmem [resolvable:$true] %s1086_s10 }
  0x61   : > { %v296_v40 = vpack.c.bf16 %v280_v37, %v279_v36  ;;  %v1432_v41 = vld [vmem:[#allocation7] ss:$8 sps:$4 sm:$0xff]   ;;  %v1437_v42 = vld [vmem:[#allocation7 + $0xf4] ss:$8 sps:$4 sm:$0xff]   ;;  %v1435_v45 = vld [vmem:[#allocation7 + $0xf0] ss:$8 sps:$4 sm:$0xff]  }
  0x62   : > { %419 = vmatpush1.bf16.msra.mxu0 %v1398_v8  ;;  %1299 = vmatpush1.bf16.msra.mxu1 %v1417_v24  ;;  %v282_v44 = vld [vmem:[%s1790_s6 + $0x38] sm:$0xff]  ;;  %v1443_v49 = vld [vmem:[#allocation7 + $0xd4] ss:$8 sps:$4 sm:$0xff]   ;;  %v1441_v52 = vld [vmem:[#allocation7 + $0xd0] ss:$8 sps:$4 sm:$0xff]   ;;  %s1539_s17 = scalar_lea.vmem %s1960_s10, 2432 }
  0x63   : > { %420 = vmatprep.subr.bf16.mxu0 %v1399_v9  ;;  %1284 = vmatprep.subr.bf16.mxu1 %v1422_v25  ;;  %v1440_v46 = vld [vmem:[#allocation7 + $0xe4] ss:$8 sps:$4 sm:$0xff]   ;;  %v297_v47 = vpack.c.bf16 %v282_v44, %v281_v43  ;;  %v1438_v48 = vld [vmem:[#allocation7 + $0xe0] ss:$8 sps:$4 sm:$0xff]   ;;  %v284_v51 = vld [vmem:[%s1790_s6 + $0x48] sm:$0xff]  ;;  %p1540_p5 = scmp.ne.s32.totalorder %s1960_s10, %s1539_s17  ;;  %p2026_p11 = scmp.ne.s32.totalorder %s2019_s23, 0 }
  0x64   : > { %v283_v50 = vld [vmem:[%s1790_s6 + $0x40] sm:$0xff]  ;;  %v285_v57 = vld [vmem:[%s1790_s6 + $0x50] sm:$0xff]  ;;  %v286_v58 = vld [vmem:[%s1790_s6 + $0x58] sm:$0xff]  ;;  %s1615_s8 = smov [#allocation8]  }
  0x65   : > { %v1446_v53 = vld [vmem:[#allocation7 + $0xc4] ss:$8 sps:$4 sm:$0xff]   ;;  %v298_v54 = vpack.c.bf16 %v284_v51, %v283_v50  ;;  %v1444_v55 = vld [vmem:[#allocation7 + $0xc0] ss:$8 sps:$4 sm:$0xff]   ;;  %v1449_v56 = vld [vmem:[#allocation7 + $0xb4] ss:$8 sps:$4 sm:$0xff]   ;;  %v299_v60 = vpack.c.bf16 %v286_v58, %v285_v57  ;;  %p1541_p7 = pnand %p1540_p5, %p2026_p11 }
  0x66   : > { %421 = vmatpush1.bf16.msra.mxu0 %v1401_v10  ;;  %1300 = vmatpush1.bf16.msra.mxu1 %v1420_v27  ;;  %v1447_v59 = vld [vmem:[#allocation7 + $0xb0] ss:$8 sps:$4 sm:$0xff]   ;;  %v290_v2 = vld [vmem:[%s1790_s6 + $0x78] sm:$0xff]  ;;  %s1543_s7 = sshll.u32 %s1615_s8, 4  ;;  %s1544_s7 = int_to_ptr.vmem [resolvable:$false] %s1543_s7 }
  0x67   : > { %422 = vmatprep.subr.bf16.mxu0 %v1402_v11  ;;  %1285 = vmatprep.subr.bf16.mxu1 %v1425_v28  ;;  %v287_v61 = vld [vmem:[%s1790_s6 + $0x60] sm:$0xff]  ;;  %v288_v62 = vld [vmem:[%s1790_s6 + $0x68] sm:$0xff]  ;;  %v289_v1 = vld [vmem:[%s1790_s6 + $0x70] sm:$0xff]  ;;  %p1542_p12 = pneg %p1541_p7  ;;  %s1545_s30 = scalar_lea.vmem %s1544_s7, 4864 }
  0x68   : > { %v300_v63 = vpack.c.bf16 %v288_v62, %v287_v61  ;;  %v301_v3 = vpack.c.bf16 %v290_v2, %v289_v1  ;;  %v291_v4 = vld [vmem:[%s1790_s6 + $0x80] sm:$0xff]  ;;  %v292_v5 = vld [vmem:[%s1790_s6 + $0x88] sm:$0xff]  ;;  %v293_v8 = vld [vmem:[%s1790_s6 + $0x90] sm:$0xff]  ;;  %p1546_p13 = scmp.lt.s32.totalorder %s1960_s10, %s1544_s7  ;;  %p1547_p0 = scmp.lt.s32.totalorder %s1545_s30, %s1539_s17 }
  0x69   : > { %v302_v6 = vpack.c.bf16 %v292_v5, %v291_v4  ;;  %v1452_v7 = vld [vmem:[#allocation7 + $0xa4] ss:$8 sps:$4 sm:$0xff]   ;;  %v1450_v9 = vld [vmem:[#allocation7 + $0xa0] ss:$8 sps:$4 sm:$0xff]   ;;  %v303_v10 = vpack.c.bf16 %v293_v8, %v293_v8  ;;  %v1455_v11 = vld [vmem:[#allocation7 + $0x94] ss:$8 sps:$4 sm:$0xff]  }
  0x6a   : > { %423 = vmatpush1.bf16.msra.mxu0 %v1404_v13  ;;  %1301 = vmatpush1.bf16.msra.mxu1 %v1423_v31  ;;  %v1458_v13 = vld [vmem:[#allocation7 + $0x84] ss:$8 sps:$4 sm:$0xff]   ;;  %p1548_p10 = por %p1547_p0, %p1546_p13 }
  0x6b   : > { %424 = vmatprep.subr.bf16.mxu0 %v1405_v15  ;;  %1286 = vmatprep.subr.bf16.mxu1 %v1428_v32 }
  0x6c   : > { %p1549_p3 = pnand %p1548_p10, %p1542_p12 }
  0x6e   : > { %425 = vmatpush1.bf16.msra.mxu0 %v1407_v17  ;;  %1302 = vmatpush1.bf16.msra.mxu1 %v1426_v34 }
  0x6f   : > { %426 = vmatprep.subr.bf16.mxu0 %v1408_v19  ;;  %1287 = vmatprep.subr.bf16.mxu1 %v1431_v35 }
  0x72   : > { %427 = vmatpush1.bf16.msra.mxu0 %v1410_v21  ;;  %1303 = vmatpush1.bf16.msra.mxu1 %v1429_v38 }
  0x73   : > { %805 = vmatprep.subr.bf16.mxu0 %v1413_v12  ;;  %1288 = vmatprep.subr.bf16.mxu1 %v1434_v39  ;;  %v1453_v12 = vld [vmem:[#allocation7 + $0x90] ss:$8 sps:$4 sm:$0xff]  }
  0x75   : > { %445 = vmatmul.mubr.bf16.vlgmr.msra.gmra.mxu0 %v294_v26 }
  0x76   : > { %454 = vmatprep.mubr.bf16.mxu0 %v1614_v0  ;;  %806 = vmatpush1.bf16.msra.mxu0 %v1411_v14  ;;  %v1456_v14 = vld [vmem:[#allocation7 + $0x80] ss:$8 sps:$4 sm:$0xff]  }
  0x77   : > { %807 = vmatprep.subr.bf16.mxu0 %v1416_v16  ;;  %1304 = vmatpush1.bf16.msra.mxu1 %v1432_v41 }
  0x78   : > { %1289 = vmatprep.subr.bf16.mxu1 %v1437_v42 }
  0x7a   : > { %808 = vmatpush1.bf16.msra.mxu0 %v1414_v18  ;;  %v320_v18 = vld [vmem:[%s2006_s2] sm:$0x3] }
  0x7b   : > { %809 = vmatprep.subr.bf16.mxu0 %v1419_v20  ;;  %1305 = vmatpush2.bf16.msra.mxu1 %v1435_v45 }
  0x7c   : > { %1290 = vmatprep.subr.bf16.mxu1 %v1440_v46 }
  0x7d   : > { %455 = vmatmul.mubr.bf16.gmra.mxu0 %v295_v33 }
  0x7e   : > { %464 = vmatprep.mubr.bf16.mxu0 %v1614_v0  ;;  %810 = vmatpush1.bf16.msra.mxu0 %v1417_v24 }
  0x7f   : > { %811 = vmatprep.subr.bf16.mxu0 %v1422_v25  ;;  %1306 = vmatpush2.bf16.msra.mxu1 %v1438_v48 }
  0x80   : > { %1291 = vmatprep.subr.bf16.mxu1 %v1443_v49 }
  0x82   : > { %812 = vmatpush1.bf16.msra.mxu0 %v1420_v27 }
  0x83   : > { %813 = vmatprep.subr.bf16.mxu0 %v1425_v28  ;;  %1307 = vmatpush2.bf16.msra.mxu1 %v1441_v52 }
  0x84   : > { %1292 = vmatprep.subr.bf16.mxu1 %v1446_v53 }
  0x85   : > { %465 = vmatmul.mubr.bf16.gmra.mxu0 %v296_v40 }
  0x86   : > { %474 = vmatprep.mubr.bf16.mxu0 %v1614_v0  ;;  %814 = vmatpush1.bf16.msra.mxu0 %v1423_v31 }
  0x87   : > { %815 = vmatprep.subr.bf16.mxu0 %v1428_v32  ;;  %1308 = vmatpush2.bf16.msra.mxu1 %v1444_v55 }
  0x88   : > { %1293 = vmatprep.subr.bf16.mxu1 %v1449_v56 }
  0x8a   : > { %816 = vmatpush1.bf16.msra.mxu0 %v1426_v34 }
  0x8b   : > { %817 = vmatprep.subr.bf16.mxu0 %v1431_v35  ;;  %1309 = vmatpush2.bf16.msra.mxu1 %v1447_v59 }
  0x8c   : > { %1294 = vmatprep.subr.bf16.mxu1 %v1452_v7 }
  0x8d   : > { %475 = vmatmul.mubr.bf16.gmra.mxu0 %v297_v47 }
  0x8e   : > { %484 = vmatprep.mubr.bf16.mxu0 %v1614_v0  ;;  %818 = vmatpush1.bf16.msra.mxu0 %v1429_v38 }
  0x8f   : > { %819 = vmatprep.subr.bf16.mxu0 %v1434_v39  ;;  %1310 = vmatpush2.bf16.msra.mxu1 %v1450_v9 }
  0x90   : > { %1295 = vmatprep.subr.bf16.mxu1 %v1455_v11 }
  0x92   : > { %820 = vmatpush1.bf16.msra.mxu0 %v1432_v41 }
  0x93   : > { %821 = vmatprep.subr.bf16.mxu0 %v1437_v42  ;;  %1311 = vmatpush2.bf16.msra.mxu1 %v1453_v12 }
  0x94   : > { %1296 = vmatprep.subr.bf16.mxu1 %v1458_v13 }
  0x95   : > { %485 = vmatmul.mubr.bf16.gmra.mxu0 %v298_v54 }
  0x96   : > { %494 = vmatprep.mubr.bf16.mxu0 %v1614_v0  ;;  %822 = vmatpush2.bf16.msra.mxu0 %v1435_v45 }
  0x97   : > { %823 = vmatprep.subr.bf16.mxu0 %v1440_v46  ;;  %1312 = vmatpush2.bf16.msra.mxu1 %v1456_v14 }
  0x9a   : > { %824 = vmatpush2.bf16.msra.mxu0 %v1438_v48 }
  0x9b   : > { %825 = vmatprep.subr.bf16.mxu0 %v1443_v49 }
  0x9d   : > { %495 = vmatmul.mubr.bf16.gmra.mxu0 %v299_v60 }
  0x9e   : > { %504 = vmatprep.mubr.bf16.mxu0 %v1614_v0  ;;  %826 = vmatpush2.bf16.msra.mxu0 %v1441_v52 }
  0x9f   : > { %827 = vmatprep.subr.bf16.mxu0 %v1446_v53 }
  0xa2   : > { %828 = vmatpush2.bf16.msra.mxu0 %v1444_v55 }
  0xa3   : > { %829 = vmatprep.subr.bf16.mxu0 %v1449_v56 }
  0xa5   : > { %505 = vmatmul.mubr.bf16.gmra.mxu0 %v300_v63 }
  0xa6   : > { %514 = vmatprep.mubr.bf16.mxu0 %v1614_v0  ;;  %830 = vmatpush2.bf16.msra.mxu0 %v1447_v59 }
  0xa7   : > { %831 = vmatprep.subr.bf16.mxu0 %v1452_v7 }
  0xaa   : > { %832 = vmatpush2.bf16.msra.mxu0 %v1450_v9 }
  0xab   : > { %833 = vmatprep.subr.bf16.mxu0 %v1455_v11 }
  0xad   : > { %515 = vmatmul.mubr.bf16.gmra.mxu0 %v301_v3 }
  0xae   : > { %524 = vmatprep.mubr.bf16.mxu0 %v1614_v0  ;;  %834 = vmatpush2.bf16.msra.mxu0 %v1453_v12 }
  0xaf   : > { %835 = vmatprep.subr.bf16.mxu0 %v1458_v13 }
  0xb2   : > { %836 = vmatpush2.bf16.msra.mxu0 %v1456_v14 }
  0xb5   : > { %525 = vmatmul.mubr.bf16.gmra.mxu0 %v302_v6 }
  0xb6   : > { %534 = vmatprep.mubr.bf16.mxu0 %v1614_v0  ;;  %v322_v0 = vlaneseq }
  0xb8   : > { %v1829_v15 = vshrl.u32 %v322_v0, 7 }
  0xba   : > { %v328_v16 = vsub.s32 1, %v1829_v15  ;;  %v324_v17 = vsub.s32 0, %v1829_v15 }
  0xbc   : > { %v1838_v20 = vrot.slane %v320_v18, %v328_v16  ;;  %v1842_v21 = vrot.slane %v320_v18, %v324_v17 }
  0xbd   : > { %535 = vmatmul.mubr.bf16.gmra.mxu0 %v303_v10 }
 0x135   : > { %v446_v19 = vpop.f32.mrf.mxu0 }
 0x136   : > { %v447_v26 = vadd.f32 %v446_v19, %v1842_v21 }
 0x137   : > { %v448_v22 = vpop.f32.mrf.mxu0 }
 0x138   : > { %v449_v24 = vadd.f32 %v448_v22, %v1838_v20  ;;  %v543_v33 = vmax.f32 %v447_v26, 0.0 }
 0x139   : > { %v450_v23 = vpop.f32.mrf.mxu0 }
 0x13a   : > { %v451_v25 = vadd.f32 %v450_v23, %v1842_v21  ;;  %v544_v31 = vmax.f32 %v449_v24, 0.0 }
 0x13b   : > { %v452_v27 = vpop.f32.mrf.mxu0 }
 0x13c   : > { %v453_v28 = vadd.f32 %v452_v27, %v1838_v20  ;;  %v545_v29 = vmax.f32 %v451_v25, 0.0 }
 0x13d   : > { %v456_v30 = vpop.f32.mrf.mxu0 }
 0x13e   : > { %v546_v32 = vmax.f32 %v453_v28, 0.0  ;;  %v581_v36 = vpack.c.bf16 %v545_v29, %v543_v33  ;;  %v457_v40 = vadd.f32 %v456_v30, %v1842_v21 }
 0x13f   : > { %v458_v34 = vpop.f32.mrf.mxu0 }
 0x140   : > { %v582_v35 = vpack.c.bf16 %v546_v32, %v544_v31  ;;  %v459_v38 = vadd.f32 %v458_v34, %v1838_v20  ;;  %v547_v47 = vmax.f32 %v457_v40, 0.0 }
 0x141   : > { %v460_v37 = vpop.f32.mrf.mxu0 }
 0x142   : > { %v461_v39 = vadd.f32 %v460_v37, %v1842_v21  ;;  %837 = vmatprep.mubr.bf16.mxu0 %v582_v35  ;;  %v548_v45 = vmax.f32 %v459_v38, 0.0 }
 0x143   : > { %v462_v41 = vpop.f32.mrf.mxu0  ;;  %838 = vmatmul.mubr.bf16.vlgmr.msra.gmra.mxu0 %v581_v36 }
 0x144   : > { %v463_v42 = vadd.f32 %v462_v41, %v1838_v20  ;;  %v549_v43 = vmax.f32 %v461_v39, 0.0 }
 0x145   : > { %v466_v44 = vpop.f32.mrf.mxu0 }
 0x146   : > { %v550_v46 = vmax.f32 %v463_v42, 0.0  ;;  %v583_v50 = vpack.c.bf16 %v549_v43, %v547_v47  ;;  %v467_v54 = vadd.f32 %v466_v44, %v1842_v21 }
 0x147   : > { %v468_v48 = vpop.f32.mrf.mxu0 }
 0x148   : > { %v584_v49 = vpack.c.bf16 %v550_v46, %v548_v45  ;;  %v469_v52 = vadd.f32 %v468_v48, %v1838_v20  ;;  %v551_v61 = vmax.f32 %v467_v54, 0.0 }
 0x149   : > { %v470_v51 = vpop.f32.mrf.mxu0 }
 0x14a   : > { %v471_v53 = vadd.f32 %v470_v51, %v1842_v21  ;;  %847 = vmatprep.mubr.bf16.mxu0 %v584_v49  ;;  %v552_v59 = vmax.f32 %v469_v52, 0.0 }
 0x14b   : > { %v472_v55 = vpop.f32.mrf.mxu0  ;;  %848 = vmatmul.mubr.bf16.gmra.mxu0 %v583_v50 }
 0x14c   : > { %v473_v56 = vadd.f32 %v472_v55, %v1838_v20  ;;  %v553_v57 = vmax.f32 %v471_v53, 0.0 }
 0x14d   : > { %v476_v58 = vpop.f32.mrf.mxu0 }
 0x14e   : > { %v554_v60 = vmax.f32 %v473_v56, 0.0  ;;  %v585_v1 = vpack.c.bf16 %v553_v57, %v551_v61  ;;  %v477_v5 = vadd.f32 %v476_v58, %v1842_v21 }
 0x14f   : > { %v478_v62 = vpop.f32.mrf.mxu0 }
 0x150   : > { %v586_v63 = vpack.c.bf16 %v554_v60, %v552_v59  ;;  %v479_v3 = vadd.f32 %v478_v62, %v1838_v20  ;;  %v555_v12 = vmax.f32 %v477_v5, 0.0 }
 0x151   : > { %v480_v2 = vpop.f32.mrf.mxu0 }
 0x152   : > { %v481_v4 = vadd.f32 %v480_v2, %v1842_v21  ;;  %857 = vmatprep.mubr.bf16.mxu1 %v586_v63  ;;  %v556_v10 = vmax.f32 %v479_v3, 0.0 }
 0x153   : > { %v482_v6 = vpop.f32.mrf.mxu0  ;;  %858 = vmatmul.mubr.bf16.vlgmr.msra.gmra.mxu1 %v585_v1 }
 0x154   : > { %v483_v7 = vadd.f32 %v482_v6, %v1838_v20  ;;  %v557_v8 = vmax.f32 %v481_v4, 0.0 }
 0x155   : > { %v486_v9 = vpop.f32.mrf.mxu0 }
 0x156   : > { %v558_v11 = vmax.f32 %v483_v7, 0.0  ;;  %v587_v0 = vpack.c.bf16 %v557_v8, %v555_v12  ;;  %v487_v23 = vadd.f32 %v486_v9, %v1842_v21 }
 0x157   : > { %v488_v13 = vpop.f32.mrf.mxu0 }
 0x158   : > { %v588_v14 = vpack.c.bf16 %v558_v11, %v556_v10  ;;  %v489_v19 = vadd.f32 %v488_v13, %v1838_v20  ;;  %v559_v30 = vmax.f32 %v487_v23, 0.0 }
 0x159   : > { %v490_v18 = vpop.f32.mrf.mxu0 }
 0x15a   : > { %v491_v22 = vadd.f32 %v490_v18, %v1842_v21  ;;  %867 = vmatprep.mubr.bf16.mxu1 %v588_v14  ;;  %v560_v28 = vmax.f32 %v489_v19, 0.0 }
 0x15b   : > { %v492_v24 = vpop.f32.mrf.mxu0  ;;  %868 = vmatmul.mubr.bf16.gmra.mxu1 %v587_v0 }
 0x15c   : > { %v493_v25 = vadd.f32 %v492_v24, %v1838_v20  ;;  %v561_v26 = vmax.f32 %v491_v22, 0.0 }
 0x15d   : > { %v496_v27 = vpop.f32.mrf.mxu0 }
 0x15e   : > { %v562_v29 = vmax.f32 %v493_v25, 0.0  ;;  %v589_v33 = vpack.c.bf16 %v561_v26, %v559_v30  ;;  %v497_v37 = vadd.f32 %v496_v27, %v1842_v21 }
 0x15f   : > { %v498_v31 = vpop.f32.mrf.mxu0 }
 0x160   : > { %v590_v32 = vpack.c.bf16 %v562_v29, %v560_v28  ;;  %v499_v35 = vadd.f32 %v498_v31, %v1838_v20  ;;  %v563_v44 = vmax.f32 %v497_v37, 0.0 }
 0x161   : > { %v500_v34 = vpop.f32.mrf.mxu0 }
 0x162   : > { %v501_v36 = vadd.f32 %v500_v34, %v1842_v21  ;;  %877 = vmatprep.mubr.bf16.mxu1 %v590_v32  ;;  %v564_v42 = vmax.f32 %v499_v35, 0.0 }
 0x163   : > { %v502_v38 = vpop.f32.mrf.mxu0  ;;  %878 = vmatmul.mubr.bf16.gmra.mxu1 %v589_v33 }
 0x164   : > { %v503_v39 = vadd.f32 %v502_v38, %v1838_v20  ;;  %v565_v40 = vmax.f32 %v501_v36, 0.0 }
 0x165   : > { %v506_v41 = vpop.f32.mrf.mxu0 }
 0x166   : > { %v566_v43 = vmax.f32 %v503_v39, 0.0  ;;  %v591_v47 = vpack.c.bf16 %v565_v40, %v563_v44  ;;  %v507_v51 = vadd.f32 %v506_v41, %v1842_v21  ;;  %v633_v39 = vld [vmem:[%s2008_s4] sm:$0x3] }
 0x167   : > { %v508_v45 = vpop.f32.mrf.mxu0 }
 0x168   : > { %v592_v46 = vpack.c.bf16 %v566_v43, %v564_v42  ;;  %v509_v49 = vadd.f32 %v508_v45, %v1838_v20  ;;  %v567_v58 = vmax.f32 %v507_v51, 0.0 }
 0x169   : > { %v510_v48 = vpop.f32.mrf.mxu0 }
 0x16a   : > { %v511_v50 = vadd.f32 %v510_v48, %v1842_v21  ;;  %887 = vmatprep.mubr.bf16.mxu1 %v592_v46  ;;  %v568_v56 = vmax.f32 %v509_v49, 0.0 }
 0x16b   : > { %v512_v52 = vpop.f32.mrf.mxu0  ;;  %888 = vmatmul.mubr.bf16.gmra.mxu1 %v591_v47 }
 0x16c   : > { %v513_v53 = vadd.f32 %v512_v52, %v1838_v20  ;;  %v569_v54 = vmax.f32 %v511_v50, 0.0 }
 0x16d   : > { %v516_v55 = vpop.f32.mrf.mxu0 }
 0x16e   : > { %v570_v57 = vmax.f32 %v513_v53, 0.0  ;;  %v593_v61 = vpack.c.bf16 %v569_v54, %v567_v58  ;;  %v517_v2 = vadd.f32 %v516_v55, %v1842_v21 }
 0x16f   : > { %v518_v59 = vpop.f32.mrf.mxu0 }
 0x170   : > { %v594_v60 = vpack.c.bf16 %v570_v57, %v568_v56  ;;  %v519_v63 = vadd.f32 %v518_v59, %v1838_v20  ;;  %v571_v9 = vmax.f32 %v517_v2, 0.0 }
 0x171   : > { %v520_v62 = vpop.f32.mrf.mxu0 }
 0x172   : > { %v521_v1 = vadd.f32 %v520_v62, %v1842_v21  ;;  %897 = vmatprep.mubr.bf16.mxu1 %v594_v60  ;;  %v572_v7 = vmax.f32 %v519_v63, 0.0 }
 0x173   : > { %v522_v3 = vpop.f32.mrf.mxu0  ;;  %898 = vmatmul.mubr.bf16.gmra.mxu1 %v593_v61 }
 0x174   : > { %v523_v4 = vadd.f32 %v522_v3, %v1838_v20  ;;  %v573_v5 = vmax.f32 %v521_v1, 0.0 }
 0x175   : > { %v526_v6 = vpop.f32.mrf.mxu0 }
 0x176   : > { %v574_v8 = vmax.f32 %v523_v4, 0.0  ;;  %v595_v12 = vpack.c.bf16 %v573_v5, %v571_v9  ;;  %v527_v18 = vadd.f32 %v526_v6, %v1842_v21 }
 0x177   : > { %v528_v10 = vpop.f32.mrf.mxu0 }
 0x178   : > { %v596_v11 = vpack.c.bf16 %v574_v8, %v572_v7  ;;  %v529_v14 = vadd.f32 %v528_v10, %v1838_v20  ;;  %v575_v27 = vmax.f32 %v527_v18, 0.0 }
 0x179   : > { %v530_v13 = vpop.f32.mrf.mxu0 }
 0x17a   : > { %v531_v0 = vadd.f32 %v530_v13, %v1842_v21  ;;  %907 = vmatprep.mubr.bf16.mxu1 %v596_v11  ;;  %v576_v25 = vmax.f32 %v529_v14, 0.0 }
 0x17b   : > { %v532_v19 = vpop.f32.mrf.mxu0  ;;  %908 = vmatmul.mubr.bf16.gmra.mxu1 %v595_v12 }
 0x17c   : > { %v533_v22 = vadd.f32 %v532_v19, %v1838_v20  ;;  %v577_v23 = vmax.f32 %v531_v0, 0.0 }
 0x17d   : > { %v536_v24 = vpop.f32.mrf.mxu0 }
 0x17e   : > { %v578_v26 = vmax.f32 %v533_v22, 0.0  ;;  %v597_v31 = vpack.c.bf16 %v577_v23, %v575_v27  ;;  %v537_v32 = vadd.f32 %v536_v24, %v1842_v21  ;;  %v1891_v21 = vrot.slane %v633_v39, %v328_v16 }
 0x17f   : > { %v538_v28 = vpop.f32.mrf.mxu0 }
 0x180   : > { %v598_v29 = vpack.c.bf16 %v578_v26, %v576_v25  ;;  %v539_v30 = vadd.f32 %v538_v28, %v1838_v20  ;;  %v579_v37 = vmax.f32 %v537_v32, 0.0  ;;  %v1887_v20 = vrot.slane %v633_v39, %v324_v17 }
 0x181   : > { %v540_v33 = vpop.f32.mrf.mxu0 }
 0x182   : > { %v580_v34 = vmax.f32 %v539_v30, 0.0  ;;  %917 = vmatprep.mubr.bf16.mxu1 %v598_v29  ;;  %v599_v38 = vpack.c.bf16 %v579_v37, %v579_v37 }
 0x183   : > { %v541_v35 = vpop.f32.mrf.mxu0  ;;  %918 = vmatmul.mubr.bf16.gmra.mxu1 %v597_v31 }
 0x184   : > { %v600_v36 = vpack.c.bf16 %v580_v34, %v580_v34 }
 0x186   : > { %927 = vmatprep.mubr.bf16.mxu1 %v600_v36 }
 0x18b   : > { %928 = vmatmul.mubr.bf16.gmra.mxu1 %v599_v38 }
 0x203   : > { %v839_v40 = vpop.f32.mrf.mxu0 }
 0x204   : > { %v840_v42 = vadd.f32 %v839_v40, %v1887_v20 }
 0x205   : > { %v841_v41 = vpop.f32.mrf.mxu0 }
 0x206   : > { %v842_v43 = vadd.f32 %v841_v41, %v1891_v21 }
 0x207   : > { %v843_v44 = vpop.f32.mrf.mxu0 }
 0x208   : > { %v1259_v45 = vpack.c.bf16 %v842_v43, %v840_v42  ;;  %v844_v15 = vadd.f32 %v843_v44, %v1887_v20 }
 0x209   : > { %v845_v46 = vpop.f32.mrf.mxu0 }
 0x20a   : > { %1052 = vst [vmem:[%s1897_s13] sm:$0xff] %v1259_v45  ;;  %v846_v16 = vadd.f32 %v845_v46, %v1891_v21 }
 0x20b   : > { %v849_v17 = vpop.f32.mrf.mxu0 }
 0x20c   : > { %v1260_v47 = vpack.c.bf16 %v846_v16, %v844_v15  ;;  %v850_v49 = vadd.f32 %v849_v17, %v1887_v20 }
 0x20d   : > { %v851_v48 = vpop.f32.mrf.mxu0 }
 0x20e   : > { %1053 = vst [vmem:[%s1897_s13 + $0x8] sm:$0xff] %v1260_v47  ;;  %v852_v50 = vadd.f32 %v851_v48, %v1891_v21 }
 0x20f   : > { %v853_v51 = vpop.f32.mrf.mxu0 }
 0x210   : > { %v1261_v52 = vpack.c.bf16 %v852_v50, %v850_v49  ;;  %v854_v54 = vadd.f32 %v853_v51, %v1887_v20 }
 0x211   : > { %v855_v53 = vpop.f32.mrf.mxu0 }
 0x212   : > { %1054 = vst [vmem:[%s1897_s13 + $0x10] sm:$0xff] %v1261_v52  ;;  %v856_v55 = vadd.f32 %v855_v53, %v1891_v21 }
 0x213   : > { %v859_v56 = vpop.f32.mrf.mxu1 }
 0x214   : > { %v1262_v57 = vpack.c.bf16 %v856_v55, %v854_v54  ;;  %v860_v59 = vadd.f32 %v859_v56, %v1887_v20 }
 0x215   : > { %v861_v58 = vpop.f32.mrf.mxu1 }
 0x216   : > { %1055 = vst [vmem:[%s1897_s13 + $0x18] sm:$0xff] %v1262_v57  ;;  %v862_v60 = vadd.f32 %v861_v58, %v1891_v21 }
 0x217   : > { %v863_v61 = vpop.f32.mrf.mxu1 }
 0x218   : > { %v1263_v62 = vpack.c.bf16 %v862_v60, %v860_v59  ;;  %v864_v1 = vadd.f32 %v863_v61, %v1887_v20 }
 0x219   : > { %v865_v63 = vpop.f32.mrf.mxu1 }
 0x21a   : > { %1056 = vst [vmem:[%s1897_s13 + $0x20] sm:$0xff] %v1263_v62  ;;  %v866_v2 = vadd.f32 %v865_v63, %v1891_v21 }
 0x21b   : > { %v869_v3 = vpop.f32.mrf.mxu1 }
 0x21c   : > { %v1264_v4 = vpack.c.bf16 %v866_v2, %v864_v1  ;;  %v870_v6 = vadd.f32 %v869_v3, %v1887_v20 }
 0x21d   : > { %v871_v5 = vpop.f32.mrf.mxu1 }
 0x21e   : > { %1057 = vst [vmem:[%s1897_s13 + $0x28] sm:$0xff] %v1264_v4  ;;  %v872_v7 = vadd.f32 %v871_v5, %v1891_v21 }
 0x21f   : > { %v873_v8 = vpop.f32.mrf.mxu1 }
 0x220   : > { %v1265_v9 = vpack.c.bf16 %v872_v7, %v870_v6  ;;  %v874_v11 = vadd.f32 %v873_v8, %v1887_v20 }
 0x221   : > { %v875_v10 = vpop.f32.mrf.mxu1 }
 0x222   : > { %1058 = vst [vmem:[%s1897_s13 + $0x30] sm:$0xff] %v1265_v9  ;;  %v876_v12 = vadd.f32 %v875_v10, %v1891_v21 }
 0x223   : > { %v879_v13 = vpop.f32.mrf.mxu1 }
 0x224   : > { %v1266_v14 = vpack.c.bf16 %v876_v12, %v874_v11  ;;  %v880_v18 = vadd.f32 %v879_v13, %v1887_v20 }
 0x225   : > { %v881_v0 = vpop.f32.mrf.mxu1 }
 0x226   : > { %1059 = vst [vmem:[%s1897_s13 + $0x38] sm:$0xff] %v1266_v14  ;;  %v882_v19 = vadd.f32 %v881_v0, %v1891_v21 }
 0x227   : > { %v883_v22 = vpop.f32.mrf.mxu1 }
 0x228   : > { %v1267_v23 = vpack.c.bf16 %v882_v19, %v880_v18  ;;  %v884_v25 = vadd.f32 %v883_v22, %v1887_v20 }
 0x229   : > { %v885_v24 = vpop.f32.mrf.mxu1 }
 0x22a   : > { %1060 = vst [vmem:[%s1897_s13 + $0x40] sm:$0xff] %v1267_v23  ;;  %v886_v26 = vadd.f32 %v885_v24, %v1891_v21 }
 0x22b   : > { %v889_v27 = vpop.f32.mrf.mxu1 }
 0x22c   : > { %v1268_v28 = vpack.c.bf16 %v886_v26, %v884_v25  ;;  %v890_v30 = vadd.f32 %v889_v27, %v1887_v20 }
 0x22d   : > { %v891_v29 = vpop.f32.mrf.mxu1 }
 0x22e   : > { %1061 = vst [vmem:[%s1897_s13 + $0x48] sm:$0xff] %v1268_v28  ;;  %v892_v31 = vadd.f32 %v891_v29, %v1891_v21 }
 0x22f   : > { %v893_v32 = vpop.f32.mrf.mxu1 }
 0x230   : > { %v1269_v33 = vpack.c.bf16 %v892_v31, %v890_v30  ;;  %v894_v35 = vadd.f32 %v893_v32, %v1887_v20 }
 0x231   : > { %v895_v34 = vpop.f32.mrf.mxu1 }
 0x232   : > { %1062 = vst [vmem:[%s1897_s13 + $0x50] sm:$0xff] %v1269_v33  ;;  %v896_v36 = vadd.f32 %v895_v34, %v1891_v21 }
 0x233   : > { %v899_v37 = vpop.f32.mrf.mxu1 }
 0x234   : > { %v1270_v38 = vpack.c.bf16 %v896_v36, %v894_v35  ;;  %v900_v40 = vadd.f32 %v899_v37, %v1887_v20 }
 0x235   : > { %v901_v39 = vpop.f32.mrf.mxu1 }
 0x236   : > { %1063 = vst [vmem:[%s1897_s13 + $0x58] sm:$0xff] %v1270_v38  ;;  %v902_v41 = vadd.f32 %v901_v39, %v1891_v21 }
 0x237   : > { %v903_v42 = vpop.f32.mrf.mxu1 }
 0x238   : > { %v1271_v43 = vpack.c.bf16 %v902_v41, %v900_v40  ;;  %v904_v45 = vadd.f32 %v903_v42, %v1887_v20 }
 0x239   : > { %v905_v44 = vpop.f32.mrf.mxu1 }
 0x23a   : > { %1064 = vst [vmem:[%s1897_s13 + $0x60] sm:$0xff] %v1271_v43  ;;  %v906_v46 = vadd.f32 %v905_v44, %v1891_v21 }
 0x23b   : > { %v909_v15 = vpop.f32.mrf.mxu1 }
 0x23c   : > { %v1272_v16 = vpack.c.bf16 %v906_v46, %v904_v45  ;;  %v910_v47 = vadd.f32 %v909_v15, %v1887_v20 }
 0x23d   : > { %v911_v17 = vpop.f32.mrf.mxu1 }
 0x23e   : > { %1065 = vst [vmem:[%s1897_s13 + $0x68] sm:$0xff] %v1272_v16  ;;  %v912_v48 = vadd.f32 %v911_v17, %v1891_v21 }
 0x23f   : > { %v913_v49 = vpop.f32.mrf.mxu1 }
 0x240   : > { %v1273_v50 = vpack.c.bf16 %v912_v48, %v910_v47  ;;  %v914_v52 = vadd.f32 %v913_v49, %v1887_v20 }
 0x241   : > { %v915_v51 = vpop.f32.mrf.mxu1 }
 0x242   : > { %1066 = vst [vmem:[%s1897_s13 + $0x70] sm:$0xff] %v1273_v50  ;;  %v916_v53 = vadd.f32 %v915_v51, %v1891_v21 }
 0x243   : > { %v919_v54 = vpop.f32.mrf.mxu1 }
 0x244   : > { %v1274_v55 = vpack.c.bf16 %v916_v53, %v914_v52  ;;  %v920_v57 = vadd.f32 %v919_v54, %v1887_v20 }
 0x245   : > { %v921_v56 = vpop.f32.mrf.mxu1 }
 0x246   : > { %1067 = vst [vmem:[%s1897_s13 + $0x78] sm:$0xff] %v1274_v55  ;;  %v922_v58 = vadd.f32 %v921_v56, %v1891_v21 }
 0x247   : > { %v923_v59 = vpop.f32.mrf.mxu1 }
 0x248   : > { %v1275_v60 = vpack.c.bf16 %v922_v58, %v920_v57  ;;  %v924_v62 = vadd.f32 %v923_v59, %v1887_v20 }
 0x249   : > { %v925_v61 = vpop.f32.mrf.mxu1 }
 0x24a   : > { %1068 = vst [vmem:[%s1897_s13 + $0x80] sm:$0xff] %v1275_v60  ;;  %v926_v63 = vadd.f32 %v925_v61, %v1891_v21 }
 0x24b   : > { %v929_v1 = vpop.f32.mrf.mxu1 }
 0x24c   : > { %v1276_v2 = vpack.c.bf16 %v926_v63, %v924_v62  ;;  %v930_v4 = vadd.f32 %v929_v1, %v1887_v20 }
 0x24d   : > { %v931_v3 = vpop.f32.mrf.mxu1 }
 0x24e   : > { %1069 = vst [vmem:[%s1897_s13 + $0x88] sm:$0xff] %v1276_v2  ;;  %v932_v5 = vadd.f32 %v931_v3, %v1891_v21 }
 0x24f   : > { %v933_v6 = vpop.f32.mrf.mxu1 }
 0x250   : > { %v1277_v7 = vpack.c.bf16 %v932_v5, %v930_v4 }
 0x251   : > { %v934_v8 = vpop.f32.mrf.mxu1 }
 0x252   : > { %1070 = vst [vmem:[%s1897_s13 + $0x90] sm:$0xff] %v1277_v7 }
 0x253   : > { %1552 = shalt.err (!%p1549_p3)
}
 0x254   : > { %s1553_s6 = scalar_lea.hbm %s1958_s12, 2432  ;;  %s1557_s9 = scalar_lea.hbm %s2009_s5, 4864 }
 0x255   : > { %p1554_p2 = scmp.ne.s32.totalorder %s1958_s12, %s1553_s6  ;;  %p1558_p4 = scmp.lt.s32.totalorder %s1958_s12, %s2009_s5 }
 0x256   : > { %p1559_p6 = scmp.lt.s32.totalorder %s1557_s9, %s1553_s6 }
 0x257   : > { %p1555_p9 = pnand %p1554_p2, %p2026_p11 }
 0x258   : > { %p1560_p8 = por %p1559_p6, %p1558_p4 }
 0x259   : > { %p1556_p1 = pneg %p1555_p9 }
 0x25b   : > { %p1561_p5 = pnand %p1560_p8, %p1556_p1 }
 0x25d   : > { %1564 = shalt.err (!%p1561_p5)
}
 0x25e   : > { %s1616_s14 = smov 128   ;;  %s1617_s28 = smov 8  }
 0x25f   : > { %1325 = dma.vmem_to_hbm [thread:$0]  (%p2026_p11), %s1960_s10, 2432, %s1958_s12, %s1072_s22, %s1616_s14, %s1616_s14, %s1617_s28  }
 0x260 PF: > { %s1101_s29 = sand.u32 1, %s1595_s18   ;;  %p2027_p7 = scmp.ne.s32.totalorder %s2016_s25, 0 }
 0x261   : > { %p2028_p12 = scmp.ge.s32.totalorder %s1607_s21, 2  ;;  %s1102_s17 = scalar_lea.sflag [#allocation4], %s1101_s29 }
 0x263   : > { %p1339_p13 = pnand %p2028_p12, %p2027_p7 }
 0x265   : > { %p1340_p0 = pneg %p1339_p13 }
 0x267   : > { %1590 = dma.done.wait (%p1340_p0), %s1102_s17, 2432  }
 0x268   : > { %1592 = vsyncadd (%p1340_p0), %s1102_s17, 4294964864  ;;  %p19_p10 = scmp.ge.s32.totalorder %s1726_s15, 4   ;;  %s2029_s18 = smov %s1599_s19 }
 0x269   : > { %s2030_s19 = smov %s1603_s20  ;;  %s2031_s20 = smov %s1742_s27 }
 0x26a   : > { %s2032_s21 = smov %s1726_s15  ;;  %21 = sbr.rel (!%p19_p10) target bundleno = 6 (0x6), region = 93 }
 0x26f   :  { %1107 = vsyncpa [#allocation3], 1 }
 0x270   :  { %1109 = vsyncpa [#allocation3 + $0x1], 1 }
 0x271   :  { %1110 = vsyncpa [#allocation6], 1 }
 0x272   :  { %1111 = vsyncpa [#allocation4], 1 }
 0x273   :  { %1113 = vsyncpa [#allocation4 + $0x1], 1 }

</bundles_post_ra>
